<compile_context>
chip_gen: v6e
topology: v6e:2x2x1
jax: 0.10.0
libtpu: 0.0.40
codegen_flags: <defaults>
</compile_context>

<pallas_src>
import math

import jax
import jax.numpy as jnp
from jax.experimental import pallas as pl
from jax.experimental.pallas import tpu as pltpu


def actor_kernel(x_ref, w1_ref, b1_ref, w2_ref, b2_ref, w3_ref, b3_ref, o_ref):
    # Cast the f32 activation tile to the MXU operand dtype in-kernel (free VPU
    # work hidden under DMA/MXU slack); accumulate in f32.
    x = x_ref[...].astype(w1_ref.dtype)
    # fc1 + relu
    h1 = jnp.dot(x, w1_ref[...], preferred_element_type=jnp.float32)
    h1 = jnp.maximum(h1 + b1_ref[...], 0.0)
    # fc2 + relu
    h2 = jnp.dot(h1.astype(w2_ref.dtype), w2_ref[...],
                 preferred_element_type=jnp.float32)
    h2 = jnp.maximum(h2 + b2_ref[...], 0.0)
    # fc3 + tanh
    h3 = jnp.dot(h2.astype(w3_ref.dtype), w3_ref[...],
                 preferred_element_type=jnp.float32)
    o_ref[...] = jnp.tanh(h3 + b3_ref[...]).astype(o_ref.dtype)


def _round_up(x, m):
    return ((x + m - 1) // m) * m


def actor_forward(state, params, *, tile_b=8192, use_bf16=True):
    """state: (B, state_size) f32.  params: dict of w1,b1,w2,b2,w3,b3 (f32)."""
    B, state_size = state.shape
    fc_units = params["w1"].shape[1]
    fc_units2 = params["w2"].shape[1]
    action_size = params["w3"].shape[1]

    # Pad the batch only to a sublane multiple of 8 (cheap / often a no-op);
    # partial final tiles are handled by Pallas' masked writes.
    b_pad = max(8, _round_up(B, 8))
    if b_pad != B:
        state = jnp.pad(state, ((0, b_pad - B), (0, 0)))

    # Clamp the tile: never larger than the batch, and keep >= 2 grid steps
    # whenever possible so the batch axis can shard across both TensorCores
    # on v7x.  Always a multiple of 8 (sublane constraint).
    tile_b = min(tile_b, b_pad)
    if b_pad >= 16:
        tile_b = min(tile_b, _round_up(pl.cdiv(b_pad, 2), 8))
    tile_b = max(8, _round_up(tile_b, 8))
    n_tiles = pl.cdiv(b_pad, tile_b)

    mxu_dtype = jnp.bfloat16 if use_bf16 else jnp.float32
    # Only the (tiny) weights/biases are cast in the wrapper; the activation
    # stream goes in as f32 and is cast inside the kernel.
    w1 = params["w1"].astype(mxu_dtype)
    w2 = params["w2"].astype(mxu_dtype)
    w3 = params["w3"].astype(mxu_dtype)
    b1 = params["b1"].astype(jnp.float32)
    b2 = params["b2"].astype(jnp.float32)
    b3 = params["b3"].astype(jnp.float32)

    resident = lambda shape: pl.BlockSpec(shape, lambda i: (0, 0))  # VMEM-resident weights

    w_itemsize = jnp.dtype(mxu_dtype).itemsize
    flops = 2 * b_pad * (state_size * fc_units + fc_units * fc_units2
                         + fc_units2 * action_size)
    bytes_accessed = (
        b_pad * state_size * 4                               # streamed f32 activations in
        + b_pad * action_size * 4                            # streamed f32 output
        + (state_size * fc_units + fc_units * fc_units2
           + fc_units2 * action_size) * w_itemsize           # weights
        + (fc_units + fc_units2 + action_size) * 4           # biases
    )
    cost = pl.CostEstimate(flops=flops,
                           transcendentals=b_pad * action_size,
                           bytes_accessed=bytes_accessed)

    out = pl.pallas_call(
        actor_kernel,
        out_shape=jax.ShapeDtypeStruct((b_pad, action_size), jnp.float32),
        grid_spec=pltpu.PrefetchScalarGridSpec(
            num_scalar_prefetch=0,
            grid=(n_tiles,),
            in_specs=[
                pl.BlockSpec((tile_b, state_size), lambda i: (i, 0)),
                resident(w1.shape), resident(b1.shape),
                resident(w2.shape), resident(b2.shape),
                resident(w3.shape), resident(b3.shape),
            ],
            out_specs=pl.BlockSpec((tile_b, action_size), lambda i: (i, 0)),
        ),
        compiler_params=pltpu.CompilerParams(
            dimension_semantics=("parallel",)),
        cost_estimate=cost,
    )(state, w1, b1, w2, b2, w3, b3)

    return out[:B]


def init_actor_params(key, state_size, action_size, fc_units=128, fc_units2=64):
    """Deterministic init mirroring the PyTorch module's reset_parameters().

    hidden_init uses weight.size()[0] == out_features, so lim = 1/sqrt(out_features)
    for fc1/fc2 weights; fc3 weights use +-3e-3. Biases follow nn.Linear's default
    uniform(-1/sqrt(in_features), 1/sqrt(in_features)).
    """
    k = jax.random.split(key, 6)
    lim1 = 1.0 / math.sqrt(fc_units)     # hidden_init(fc1): weight.size()[0] = fc_units
    lim2 = 1.0 / math.sqrt(fc_units2)    # hidden_init(fc2): weight.size()[0] = fc_units2
    lim3 = 3e-3

    # Weights stored transposed: (in_features, out_features) so the kernel does x @ W.
    w1 = jax.random.uniform(k[0], (state_size, fc_units), jnp.float32, -lim1, lim1)
    w2 = jax.random.uniform(k[1], (fc_units, fc_units2), jnp.float32, -lim2, lim2)
    w3 = jax.random.uniform(k[2], (fc_units2, action_size), jnp.float32, -lim3, lim3)

    b1 = jax.random.uniform(k[3], (1, fc_units), jnp.float32,
                            -1.0 / math.sqrt(state_size), 1.0 / math.sqrt(state_size))
    b2 = jax.random.uniform(k[4], (1, fc_units2), jnp.float32,
                            -1.0 / math.sqrt(fc_units), 1.0 / math.sqrt(fc_units))
    b3 = jax.random.uniform(k[5], (1, action_size), jnp.float32,
                            -1.0 / math.sqrt(fc_units2), 1.0 / math.sqrt(fc_units2))
    return {"w1": w1, "b1": b1, "w2": w2, "b2": b2, "w3": w3, "b3": b3}


def actor_reference(state, p, *, use_bf16=False):
    """Pure-JAX reference.  With use_bf16=True the matmul operands are rounded to
    bf16 exactly as in the kernel (f32 math otherwise), for tight comparisons."""
    if use_bf16:
        cast = lambda a: a.astype(jnp.bfloat16).astype(jnp.float32)
    else:
        cast = lambda a: a
    h1 = jax.nn.relu(cast(state) @ cast(p["w1"]) + p["b1"])
    h2 = jax.nn.relu(cast(h1) @ cast(p["w2"]) + p["b2"])
    return jnp.tanh(cast(h2) @ cast(p["w3"]) + p["b3"])


if __name__ == "__main__":
    key = jax.random.PRNGKey(0)
    k_state, k_state2, k_state3, k_params = jax.random.split(key, 4)

    state_size = 32
    action_size = 4
    params = init_actor_params(k_params, state_size, action_size)

    # Small primary test (batch=8, single grid step).
    batch = 8
    state = jax.random.normal(k_state, (batch, state_size), jnp.float32)
    out = jax.block_until_ready(actor_forward(state, params))
    assert out.shape == (batch, action_size)

    # Tight check vs a reference that applies the same bf16 operand rounding.
    ref_bf16 = actor_reference(state, params, use_bf16=True)
    assert jnp.allclose(out, ref_bf16, atol=1e-4, rtol=1e-4), "mismatch vs bf16-rounded reference"
    # Loose sanity check vs the pure-f32 reference (bf16 quantization tolerance).
    ref_f32 = actor_reference(state, params, use_bf16=False)
    assert jnp.allclose(out, ref_f32, atol=3e-2, rtol=3e-2), "mismatch vs f32 reference"

    # Secondary test: batch not a multiple of 8 (exercises sublane padding and
    # a partial final tile across 2 grid steps).
    batch2 = 50
    state2 = jax.random.normal(k_state2, (batch2, state_size), jnp.float32)
    out2 = jax.block_until_ready(actor_forward(state2, params))
    assert out2.shape == (batch2, action_size)
    ref2 = actor_reference(state2, params, use_bf16=True)
    assert jnp.allclose(out2, ref2, atol=1e-4, rtol=1e-4), "mismatch on padded batch"

    # Third test: larger batch that splits into >=2 tiles with a partial tail.
    batch3 = 1000
    state3 = jax.random.normal(k_state3, (batch3, state_size), jnp.float32)
    out3 = jax.block_until_ready(actor_forward(state3, params))
    assert out3.shape == (batch3, action_size)
    ref3 = actor_reference(state3, params, use_bf16=True)
    assert jnp.allclose(out3, ref3, atol=1e-4, rtol=1e-4), "mismatch on multi-tile batch"

    print("KERNEL_OK")
</pallas_src>

<mosaic_0001>
module attributes {stable_mosaic.version = 11 : i64} {
  func.func @actor_kernel(%arg0: i32, %arg1: memref<8x32xf32, #tpu.memory_space<vmem>>, %arg2: memref<32x128xbf16, #tpu.memory_space<vmem>>, %arg3: memref<1x128xf32, #tpu.memory_space<vmem>>, %arg4: memref<128x64xbf16, #tpu.memory_space<vmem>>, %arg5: memref<1x64xf32, #tpu.memory_space<vmem>>, %arg6: memref<64x4xbf16, #tpu.memory_space<vmem>>, %arg7: memref<1x4xf32, #tpu.memory_space<vmem>>, %arg8: memref<8x4xf32, #tpu.memory_space<vmem>>) attributes {dimension_semantics = [#tpu.dimension_semantics<parallel>], iteration_bounds = array<i64: 1>, scalar_prefetch = 0 : i64, scratch_operands = 0 : i64, tpu.core_type = #tpu.core_type<tc>, window_params = [{transform_indices = @transform_0, window_bounds = array<i64: 8, 32>}, {pipeline_mode = #tpu.pipeline_mode<synchronous>, transform_indices = @transform_1, window_bounds = array<i64: 32, 128>}, {pipeline_mode = #tpu.pipeline_mode<synchronous>, transform_indices = @transform_2, window_bounds = array<i64: 1, 128>}, {pipeline_mode = #tpu.pipeline_mode<synchronous>, transform_indices = @transform_3, window_bounds = array<i64: 128, 64>}, {pipeline_mode = #tpu.pipeline_mode<synchronous>, transform_indices = @transform_4, window_bounds = array<i64: 1, 64>}, {pipeline_mode = #tpu.pipeline_mode<synchronous>, transform_indices = @transform_5, window_bounds = array<i64: 64, 4>}, {pipeline_mode = #tpu.pipeline_mode<synchronous>, transform_indices = @transform_6, window_bounds = array<i64: 1, 4>}, {transform_indices = @transform_7, window_bounds = array<i64: 8, 4>}]} {
    %c0 = arith.constant 0 : index
    %c0_0 = arith.constant 0 : index
    %0 = vector.load %arg1[%c0, %c0_0] : memref<8x32xf32, #tpu.memory_space<vmem>>, vector<8x32xf32>
    %1 = arith.truncf %0 : vector<8x32xf32> to vector<8x32xbf16>
    %c0_1 = arith.constant 0 : index
    %c0_2 = arith.constant 0 : index
    %2 = vector.load %arg2[%c0_1, %c0_2] : memref<32x128xbf16, #tpu.memory_space<vmem>>, vector<32x128xbf16>
    %cst = arith.constant dense<0.000000e+00> : vector<8x128xf32>
    %3 = tpu.matmul %1, %2, %cst {dimension_numbers = #tpu.dot_dimension_numbers<[1], [0], [0], [1], [0, 0, 1, 1], [], []>} : vector<8x32xbf16>, vector<32x128xbf16>, vector<8x128xf32> -> vector<8x128xf32>
    %c0_3 = arith.constant 0 : index
    %c0_4 = arith.constant 0 : index
    %4 = vector.load %arg3[%c0_3, %c0_4] : memref<1x128xf32, #tpu.memory_space<vmem>>, vector<1x128xf32>
    %5 = vector.broadcast %4 : vector<1x128xf32> to vector<8x128xf32>
    %6 = arith.addf %3, %5 : vector<8x128xf32>
    %cst_5 = arith.constant 0.000000e+00 : f32
    %7 = vector.broadcast %cst_5 : f32 to vector<8x128xf32>
    %8 = arith.maximumf %6, %7 : vector<8x128xf32>
    %9 = arith.truncf %8 : vector<8x128xf32> to vector<8x128xbf16>
    %c0_6 = arith.constant 0 : index
    %c0_7 = arith.constant 0 : index
    %10 = vector.load %arg4[%c0_6, %c0_7] : memref<128x64xbf16, #tpu.memory_space<vmem>>, vector<128x64xbf16>
    %cst_8 = arith.constant dense<0.000000e+00> : vector<8x64xf32>
    %11 = tpu.matmul %9, %10, %cst_8 {dimension_numbers = #tpu.dot_dimension_numbers<[1], [0], [0], [1], [0, 0, 1, 1], [], []>} : vector<8x128xbf16>, vector<128x64xbf16>, vector<8x64xf32> -> vector<8x64xf32>
    %c0_9 = arith.constant 0 : index
    %c0_10 = arith.constant 0 : index
    %12 = vector.load %arg5[%c0_9, %c0_10] : memref<1x64xf32, #tpu.memory_space<vmem>>, vector<1x64xf32>
    %13 = vector.broadcast %12 : vector<1x64xf32> to vector<8x64xf32>
    %14 = arith.addf %11, %13 : vector<8x64xf32>
    %cst_11 = arith.constant 0.000000e+00 : f32
    %15 = vector.broadcast %cst_11 : f32 to vector<8x64xf32>
    %16 = arith.maximumf %14, %15 : vector<8x64xf32>
    %17 = arith.truncf %16 : vector<8x64xf32> to vector<8x64xbf16>
    %c0_12 = arith.constant 0 : index
    %c0_13 = arith.constant 0 : index
    %18 = vector.load %arg6[%c0_12, %c0_13] : memref<64x4xbf16, #tpu.memory_space<vmem>>, vector<64x4xbf16>
    %cst_14 = arith.constant dense<0.000000e+00> : vector<8x4xf32>
    %19 = tpu.matmul %17, %18, %cst_14 {dimension_numbers = #tpu.dot_dimension_numbers<[1], [0], [0], [1], [0, 0, 1, 1], [], []>} : vector<8x64xbf16>, vector<64x4xbf16>, vector<8x4xf32> -> vector<8x4xf32>
    %c0_15 = arith.constant 0 : index
    %c0_16 = arith.constant 0 : index
    %20 = vector.load %arg7[%c0_15, %c0_16] : memref<1x4xf32, #tpu.memory_space<vmem>>, vector<1x4xf32>
    %21 = vector.broadcast %20 : vector<1x4xf32> to vector<8x4xf32>
    %22 = arith.addf %19, %21 : vector<8x4xf32>
    %23 = math.tanh %22 : vector<8x4xf32>
    %c0_17 = arith.constant 0 : index
    %c0_18 = arith.constant 0 : index
    %24 = vector.load %arg8[%c0_17, %c0_18] : memref<8x4xf32, #tpu.memory_space<vmem>>, vector<8x4xf32>
    tpu.vector_store %arg8[%c0_17, %c0_18], %23 {strides = array<i32>} : memref<8x4xf32, #tpu.memory_space<vmem>>, vector<8x4xf32>,
    return
  }
  func.func @transform_0(%arg0: i32) -> (i32, i32) {
    %c0_i32 = arith.constant 0 : i32
    %c0_i32_0 = arith.constant 0 : i32
    return %arg0, %c0_i32 : i32, i32
  }
  func.func @transform_1(%arg0: i32) -> (i32, i32) {
    %c0_i32 = arith.constant 0 : i32
    %c0_i32_0 = arith.constant 0 : i32
    %c0_i32_1 = arith.constant 0 : i32
    return %c0_i32, %c0_i32_0 : i32, i32
  }
  func.func @transform_2(%arg0: i32) -> (i32, i32) {
    %c0_i32 = arith.constant 0 : i32
    %c0_i32_0 = arith.constant 0 : i32
    %c0_i32_1 = arith.constant 0 : i32
    return %c0_i32, %c0_i32_0 : i32, i32
  }
  func.func @transform_3(%arg0: i32) -> (i32, i32) {
    %c0_i32 = arith.constant 0 : i32
    %c0_i32_0 = arith.constant 0 : i32
    %c0_i32_1 = arith.constant 0 : i32
    return %c0_i32, %c0_i32_0 : i32, i32
  }
  func.func @transform_4(%arg0: i32) -> (i32, i32) {
    %c0_i32 = arith.constant 0 : i32
    %c0_i32_0 = arith.constant 0 : i32
    %c0_i32_1 = arith.constant 0 : i32
    return %c0_i32, %c0_i32_0 : i32, i32
  }
  func.func @transform_5(%arg0: i32) -> (i32, i32) {
    %c0_i32 = arith.constant 0 : i32
    %c0_i32_0 = arith.constant 0 : i32
    %c0_i32_1 = arith.constant 0 : i32
    return %c0_i32, %c0_i32_0 : i32, i32
  }
  func.func @transform_6(%arg0: i32) -> (i32, i32) {
    %c0_i32 = arith.constant 0 : i32
    %c0_i32_0 = arith.constant 0 : i32
    %c0_i32_1 = arith.constant 0 : i32
    return %c0_i32, %c0_i32_0 : i32, i32
  }
  func.func @transform_7(%arg0: i32) -> (i32, i32) {
    %c0_i32 = arith.constant 0 : i32
    %c0_i32_0 = arith.constant 0 : i32
    return %arg0, %c0_i32 : i32, i32
  }
}

</mosaic_0001>

<bundles_post_ra>
// kernel: tpu_custom_call.1
= control target key start
LH: loop header
LB: loop body
LE: loop exit
PB: predicated region body
PF: predicated region fallthrough
CT: control target
= control target key end

     0   :  { %v395_v0 = vmov 0.0   ;;  %vm396_vm0 = vmmov 0   ;;  %vm52_vm1 = vcmask 261120   ;;  %vm250_vm2 = vcmask 523264   ;;  %s497_s1 = inlined_call_operand.vmem [shape: bf16[32,128], index: 1, kind: input, shape index: {}]   ;;  %s498_s0 = inlined_call_operand.vmem [shape: f32[8,32], index: 0, kind: input, shape index: {}]   ;;  %s499_s3 = inlined_call_operand.vmem [shape: bf16[128,64], index: 3, kind: input, shape index: {}]   ;;  %s500_s5 = inlined_call_operand.vmem [shape: bf16[64,4], index: 5, kind: input, shape index: {}]   ;;  %s501_s2 = inlined_call_operand.vmem [shape: f32[1,128], index: 2, kind: input, shape index: {}]   ;;  %s502_s4 = inlined_call_operand.vmem [shape: f32[1,64], index: 4, kind: input, shape index: {}]   ;;  %s503_s6 = inlined_call_operand.vmem [shape: f32[1,4], index: 6, kind: input, shape index: {}]   ;;  %s504_s7 = inlined_call_operand.vmem [shape: f32[8,4], index: 7, kind: output, shape index: {}]  }
   0x1   :  { %337 = vmatprep.subr.bf16.mxu0 %v395_v0  ;;  %v379_v1 = vld [vmem:[%s497_s1 + $0x8] sm:$0xff]   ;;  %341 = vmatprep.mubr.msk.bf16.mxu0 %vm396_vm0, %v395_v0  ;;  %v380_v2 = vld [vmem:[%s497_s1] sm:$0xff]   ;;  %v381_v4 = vld [vmem:[%s499_s3 + $0x38] sm:$0xff]   ;;  %vm295_vm3 = vcmask 31744  }
   0x2   :  { %345 = vmatprep.subr.bf16.mxu1 %v395_v0  ;;  %361 = vmatprep.mubr.msk.bf16.mxu1 %vm396_vm0, %v395_v0  ;;  %v27_v3 = vld [vmem:[%s498_s0] sm:$0xff]  ;;  %v382_v6 = vld [vmem:[%s499_s3 + $0x30] sm:$0xff]   ;;  %v383_v7 = vld [vmem:[%s499_s3 + $0x28] sm:$0xff]  }
   0x3   :  { %338 = vmatpush3.bf16.msra.mxu0 %v379_v1  ;;  %v28_v5 = vpack.c.bf16 %v27_v3, %v27_v3  ;;  %346 = vmatpush3.bf16.msra.mxu1 %v381_v4  ;;  %v384_v8 = vld [vmem:[%s499_s3 + $0x20] sm:$0xff]   ;;  %v385_v9 = vld [vmem:[%s499_s3 + $0x18] sm:$0xff]   ;;  %v386_v10 = vld [vmem:[%s499_s3 + $0x10] sm:$0xff]  }
   0x4   :  { %339 = vmatprep.subr.bf16.mxu0 %v395_v0  ;;  %347 = vmatprep.subr.bf16.mxu1 %v395_v0  ;;  %v387_v11 = vld [vmem:[%s499_s3 + $0x8] sm:$0xff]   ;;  %v388_v12 = vld [vmem:[%s499_s3] sm:$0xff]   ;;  %v389_v13 = vld [vmem:[%s500_s5 + $0x18] sm:$0xff]  }
   0x5   :  { %v390_v14 = vld [vmem:[%s500_s5 + $0x10] sm:$0xff]   ;;  %v301_v15 = vld [vmem:[%s501_s2] ss:$0 sm:$0xff]  ;;  %v391_v23 = vld [vmem:[%s500_s5 + $0x8] sm:$0xff]  }
   0x6   :  { %v392_v24 = vld [vmem:[%s500_s5] sm:$0xff]  }
   0x7   :  { %340 = vmatpush3.bf16.msra.mxu0 %v380_v2  ;;  %348 = vmatpush3.bf16.msra.mxu1 %v382_v6  ;;  %v305_v25 = vld [vmem:[%s502_s4] ss:$0 sm:$0xff] }
   0x8   :  { %365 = vmatprep.subr.bf16.mxu0 %v395_v0  ;;  %349 = vmatprep.subr.bf16.mxu1 %v395_v0  ;;  %v314_v33 = vld [vmem:[%s503_s6] ss:$0 sm:$0xff] }
   0xa   :  { %342 = vmatmul.mubr.msk.bf16.vlgmr.msra.gmra.mxu0 %vm52_vm1, %v28_v5 }
   0xb   :  { %373 = vmatprep.mubr.msk.bf16.mxu0 %vm396_vm0, %v395_v0  ;;  %350 = vmatpush3.bf16.msra.mxu1 %v383_v7 }
   0xc   :  { %351 = vmatprep.subr.bf16.mxu1 %v395_v0  ;;  %366 = vmatpush3.bf16.msra.mxu0 %v389_v13 }
   0xd   :  { %367 = vmatprep.subr.bf16.mxu0 %v395_v0 }
   0xf   :  { %352 = vmatpush3.bf16.msra.mxu1 %v384_v8 }
  0x10   :  { %353 = vmatprep.subr.bf16.mxu1 %v395_v0  ;;  %368 = vmatpush3.bf16.msra.mxu0 %v390_v14 }
  0x11   :  { %369 = vmatprep.subr.bf16.mxu0 %v395_v0 }
  0x13   :  { %354 = vmatpush3.bf16.msra.mxu1 %v385_v9 }
  0x14   :  { %355 = vmatprep.subr.bf16.mxu1 %v395_v0  ;;  %370 = vmatpush3.bf16.msra.mxu0 %v391_v23 }
  0x15   :  { %371 = vmatprep.subr.bf16.mxu0 %v395_v0 }
  0x17   :  { %356 = vmatpush3.bf16.msra.mxu1 %v386_v10 }
  0x18   :  { %357 = vmatprep.subr.bf16.mxu1 %v395_v0  ;;  %372 = vmatpush3.bf16.msra.mxu0 %v392_v24 }
  0x1b   :  { %358 = vmatpush3.bf16.msra.mxu1 %v387_v11 }
  0x1c   :  { %359 = vmatprep.subr.bf16.mxu1 %v395_v0 }
  0x1f   :  { %360 = vmatpush3.bf16.msra.mxu1 %v388_v12 }
  0xca   :  { %v90_v16 = vpop.f32.mrf.mxu0 }
  0xcb   :  { %v91_v17 = vadd.f32 %v301_v15, %v90_v16 }
  0xcc   :  { %v343_v18 = vpop.f32.mrf.mxu0 }
  0xcd   :  { %v96_v19 = vmax.f32 %v91_v17, 0.0 }
  0xce   :  { %v93_v20 = vpop.f32.mrf.mxu0 }
  0xcf   :  { %v97_v21 = vpack.c.bf16 %v96_v19, %v96_v19 }
  0xd0   :  { %v344_v22 = vpop.f32.mrf.mxu0 }
  0xd1   :  { %362 = vmatmul.mubr.bf16.vlgmr.msra.gmra.mxu1 %v97_v21 }
 0x191   :  { %v203_v26 = vpop.f32.mrf.mxu1 }
 0x192   :  { %v204_v27 = vadd.f32 %v305_v25, %v203_v26 }
 0x193   :  { %v363_v28 = vpop.f32.mrf.mxu1 }
 0x194   :  { %v209_v29 = vmax.f32 %v204_v27, 0.0 }
 0x195   :  { %v206_v30 = vpop.f32.mrf.mxu1 }
 0x196   :  { %v210_v31 = vpack.c.bf16 %v209_v29, %v209_v29 }
 0x197   :  { %v364_v32 = vpop.f32.mrf.mxu1 }
 0x198   :  { %374 = vmatmul.mubr.msk.bf16.vlgmr.msra.gmra.mxu0 %vm250_vm2, %v210_v31 }
 0x258   :  { %v288_v34 = vpop.f32.mrf.mxu0 }
 0x259   :  { %v289_v35 = vadd.f32 %v314_v33, %v288_v34 }
 0x25a   :  { %v375_v36 = vpop.f32.mrf.mxu0 }
 0x25b   :  { %393 = vtanh.f32 %v289_v35 }
 0x25c   :  { %v291_v37 = vpop.f32.mrf.mxu0 }
 0x25e   :  { %v376_v38 = vpop.f32.mrf.mxu0 }
 0x268   :  { %v394_v39 = vpop.eup %393 }
 0x269   :  { %296 = vst.msk [vmem:[%s504_s7] sm:$0xff] %vm295_vm3, %v394_v39 }

</bundles_post_ra>
